<compile_context>
chip_gen: v7x
topology: tpu7x:2x2x1
jax: 0.10.0
libtpu: 0.0.40
codegen_flags: <defaults>
</compile_context>

<pallas_src>
import functools

import jax
import jax.numpy as jnp
from jax.experimental import pallas as pl
from jax.experimental.pallas import tpu as pltpu

_MIB = 1024 * 1024


# ---------------------------------------------------------------------------
# Hardware-aware sizing helpers.
# ---------------------------------------------------------------------------
def _tpu_vmem_capacity_bytes():
    try:
        return int(pltpu.get_tpu_info().vmem_capacity_bytes)
    except Exception:
        return 64 * _MIB  # conservative fallback (v7x per-core VMEM)


def _vmem_budget_bytes():
    """Tile-sizing budget: ~40 MiB on 64 MiB parts, ~96 MiB on 128 MiB parts."""
    cap = _tpu_vmem_capacity_bytes()
    return max(32 * _MIB, cap - max(24 * _MIB, cap // 4))


def _vmem_limit_bytes(needed):
    """Scoped-VMEM limit for a pass: cover what we use, stay below physical."""
    cap = _tpu_vmem_capacity_bytes()
    return int(min(cap - 8 * _MIB, max(32 * _MIB, needed + 4 * _MIB)))


def _native_elementwise_ok():
    """bf16 VPU math only on >= v6 (v5e/v5p have no bf16 VALU lanes)."""
    try:
        kind = jax.devices()[0].device_kind.lower()
    except Exception:
        return False
    return not any(v in kind for v in ("v2", "v3", "v4", "v5"))


def _pick_tile_hw(c, hw, itemsize, n_slabs, budget):
    """Largest lane-dense HW tile with `n_slabs` live (1,C,tile) slabs in VMEM."""
    per_lane = max(1, n_slabs * c * itemsize)  # bytes per HW column held live
    max_by_vmem = max(1, budget // per_lane)
    if hw <= max_by_vmem and hw <= 4096:
        return hw                                # whole spatial extent, one block
    t = min(hw, 2048, max_by_vmem)
    t = max(128, (t // 128) * 128)               # lane-dense multiple of 128
    for cand in range(t, 127, -128):             # prefer an exact divisor of HW
        if hw % cand == 0:
            return cand
    return t
    # TODO(synk): for extreme C (4*C*128*itemsize > budget) the minimal 128-lane
    # tile can still exceed the budget; a C-tiled variant would be needed there.


# ---------------------------------------------------------------------------
# Fused path: pool + FC + apply in a single HBM sweep (per-sample resident).
# ---------------------------------------------------------------------------
def _ata_fused_kernel(w1l_ref, w1h_ref, b1_ref, w2_ref, b2_ref,
                      low_ref, high_ref, out_ref, *, inv_hw, native):
    low = low_ref[0]                                   # (C, HW)
    high = high_ref[0]

    # Pooled channel means, always accumulated in f32.
    mean_low = jnp.sum(low.astype(jnp.float32), axis=-1, keepdims=True) * inv_hw
    mean_high = jnp.sum(high.astype(jnp.float32), axis=-1, keepdims=True) * inv_hw

    # Tiny FC stack (matvecs; negligible MXU work next to the slab DMA).
    hid = (jnp.dot(w1l_ref[...], mean_low, preferred_element_type=jnp.float32)
           + jnp.dot(w1h_ref[...], mean_high, preferred_element_type=jnp.float32)
           + b1_ref[...])
    hid = jnp.maximum(hid, 0.0)
    s = jax.nn.sigmoid(
        jnp.dot(w2_ref[...], hid, preferred_element_type=jnp.float32)
        + b2_ref[...])                                 # (C, 1)

    if native:      # bf16 multiply-add on chips with bf16 VPU lanes
        out_ref[0] = low * s.astype(low.dtype) + high
    else:           # f32 path (always correct; identity casts for f32 inputs)
        out_ref[0] = (low.astype(jnp.float32) * s
                      + high.astype(jnp.float32)).astype(out_ref.dtype)


# ---------------------------------------------------------------------------
# Fallback pass 1: tiled global pool (raw sums; normalization in wrapper).
# Grid = (N, 2, n_red): middle axis is a parallel HW split (v7x megacore).
# ---------------------------------------------------------------------------
def _ata_pool_kernel(low_ref, high_ref, sum_low_ref, sum_high_ref, *,
                     hw, tile_hw, n_red, ragged):
    p = pl.program_id(1)
    k = pl.program_id(2)

    @pl.when(k == 0)
    def _init():
        sum_low_ref[...] = jnp.zeros_like(sum_low_ref)
        sum_high_ref[...] = jnp.zeros_like(sum_high_ref)

    low = low_ref[...].astype(jnp.float32)             # (1, C, tile_hw)
    high = high_ref[...].astype(jnp.float32)

    if ragged:
        # Mask padded / duplicated lanes so they don't bias the sum.
        t = p * n_red + k                               # logical tile index
        lane = jax.lax.broadcasted_iota(jnp.int32, low.shape, 2)
        valid = (t * tile_hw + lane) < hw
        low = jnp.where(valid, low, 0.0)
        high = jnp.where(valid, high, 0.0)

    shp = sum_low_ref.shape                             # (1, 1, C, 1)
    sum_low_ref[...] += jnp.sum(low, axis=-1, keepdims=True).reshape(shp)
    sum_high_ref[...] += jnp.sum(high, axis=-1, keepdims=True).reshape(shp)


# ---------------------------------------------------------------------------
# Fallback pass 2: tiled elementwise apply  out = low * s + high.
# ---------------------------------------------------------------------------
def _ata_apply_kernel(s_ref, low_ref, high_ref, out_ref, *, native):
    if native:
        s = s_ref[...].astype(out_ref.dtype)            # (1, C, 1)
        out_ref[...] = low_ref[...] * s + high_ref[...]
    else:
        s = s_ref[...].astype(jnp.float32)
        out_ref[...] = (low_ref[...].astype(jnp.float32) * s
                        + high_ref[...].astype(jnp.float32)).astype(out_ref.dtype)


# ---------------------------------------------------------------------------
# Wrapper.
# ---------------------------------------------------------------------------
def ata_forward(low_x, high_x, params, *,
                donate_high=False, force_two_pass=False, tile_hw_override=None):
    """low_x, high_x: (N, C, H, W). Returns (N, C, H, W) in low_x.dtype."""
    n, c, h, w = low_x.shape
    hw = h * w
    out_dtype = low_x.dtype
    itemsize = jnp.dtype(out_dtype).itemsize
    inv_hw = 1.0 / float(hw)

    low = low_x.reshape(n, c, hw)        # free reshape, no dtype cast round trip
    high = high_x.reshape(n, c, hw)

    w1 = params["w1"].astype(jnp.float32)    # (hidden, 2C)
    b1 = params["b1"].astype(jnp.float32)    # (hidden,)
    w2 = params["w2"].astype(jnp.float32)    # (C, hidden)
    b2 = params["b2"].astype(jnp.float32)    # (C,)
    hidden = w1.shape[0]

    budget = _vmem_budget_bytes()
    native = (jnp.dtype(out_dtype) == jnp.bfloat16) and _native_elementwise_ok()
    alias_ok = donate_high and high.dtype == out_dtype

    # ---- fused single-sweep path --------------------------------------------
    slab = c * hw * itemsize
    # 2 bufs x (low + high + out) + possible f32 temporaries for bf16 pooling.
    fused_needed = 6 * slab + (8 * c * hw if itemsize < 4 else 0) + 2 * _MIB
    if not force_two_pass and fused_needed <= budget:
        w1l, w1h = w1[:, :c], w1[:, c:]
        full = lambda i: (0, 0)
        slab_spec = pl.BlockSpec((1, c, hw), lambda i: (i, 0, 0))
        out = pl.pallas_call(
            functools.partial(_ata_fused_kernel, inv_hw=inv_hw, native=native),
            out_shape=jax.ShapeDtypeStruct((n, c, hw), out_dtype),
            grid=(n,),
            in_specs=[pl.BlockSpec((hidden, c), full),
                      pl.BlockSpec((hidden, c), full),
                      pl.BlockSpec((hidden, 1), full),
                      pl.BlockSpec((c, hidden), full),
                      pl.BlockSpec((c, 1), full),
                      slab_spec, slab_spec],
            out_specs=slab_spec,
            input_output_aliases=({6: 0} if alias_ok else {}),
            compiler_params=pltpu.CompilerParams(
                dimension_semantics=("parallel",),
                vmem_limit_bytes=_vmem_limit_bytes(fused_needed)),
        )(w1l, w1h, b1.reshape(hidden, 1), w2, b2.reshape(c, 1), low, high)
        return out.reshape(n, c, h, w)

    # ---- pass 1: pooled channel sums (f32 accumulation, reduction last) ----
    tile_pool = tile_hw_override or _pick_tile_hw(c, hw, itemsize, 4, budget)
    n_hw = pl.cdiv(hw, tile_pool)
    n_par = 2 if n_hw >= 2 else 1            # parallel HW split for v7x megacore
    n_red = pl.cdiv(n_hw, n_par)
    ragged = (hw % tile_pool != 0) or (n_par * n_red != n_hw)

    pool_slab_spec = pl.BlockSpec(
        (1, c, tile_pool),
        lambda i, p, k: (i, 0, jnp.minimum(p * n_red + k, n_hw - 1)))
    sum_spec = pl.BlockSpec((1, 1, c, 1), lambda i, p, k: (i, p, 0, 0))
    pool_needed = 4 * c * tile_pool * itemsize + 8 * n_par * c * 4

    sum_low, sum_high = pl.pallas_call(
        functools.partial(_ata_pool_kernel, hw=hw, tile_hw=tile_pool,
                          n_red=n_red, ragged=ragged),
        out_shape=(jax.ShapeDtypeStruct((n, n_par, c, 1), jnp.float32),
                   jax.ShapeDtypeStruct((n, n_par, c, 1), jnp.float32)),
        grid=(n, n_par, n_red),
        in_specs=[pool_slab_spec, pool_slab_spec],
        out_specs=(sum_spec, sum_spec),
        compiler_params=pltpu.CompilerParams(
            dimension_semantics=("parallel", "parallel", "arbitrary"),
            vmem_limit_bytes=_vmem_limit_bytes(pool_needed)),
    )(low, high)

    # ---- tiny FC stack (N x 2C -> hidden -> N x C) in plain XLA -------------
    mean_low = jnp.sum(sum_low, axis=1)[..., 0] * inv_hw       # (N, C)
    mean_high = jnp.sum(sum_high, axis=1)[..., 0] * inv_hw
    pooled = jnp.concatenate([mean_low, mean_high], axis=1)    # (N, 2C)
    hid = jnp.maximum(pooled @ w1.T + b1, 0.0)
    scale = jax.nn.sigmoid(hid @ w2.T + b2)                    # (N, C)
    scale = scale.reshape(n, c, 1).astype(jnp.float32)

    # ---- pass 2: tiled elementwise apply ------------------------------------
    tile_apply = tile_hw_override or _pick_tile_hw(c, hw, itemsize, 6, budget)
    n_hw_a = pl.cdiv(hw, tile_apply)
    apply_slab_spec = pl.BlockSpec((1, c, tile_apply), lambda i, k: (i, 0, k))
    col_spec = pl.BlockSpec((1, c, 1), lambda i, k: (i, 0, 0))
    apply_needed = 6 * c * tile_apply * itemsize + 2 * c * 4

    out = pl.pallas_call(
        functools.partial(_ata_apply_kernel, native=native),
        out_shape=jax.ShapeDtypeStruct((n, c, hw), out_dtype),
        grid=(n, n_hw_a),
        in_specs=[col_spec, apply_slab_spec, apply_slab_spec],
        out_specs=apply_slab_spec,
        input_output_aliases=({2: 0} if alias_ok else {}),
        compiler_params=pltpu.CompilerParams(
            dimension_semantics=("parallel", "parallel"),
            vmem_limit_bytes=_vmem_limit_bytes(apply_needed)),
    )(scale, low, high)

    return out.reshape(n, c, h, w)


def init_ata_params(key, inchannels, reduction=8):
    """Matches ATA.init_params: Linear weights ~ N(0, 0.01), biases = 0."""
    hidden = inchannels // reduction
    k1, k2 = jax.random.split(key)
    return {
        "w1": 0.01 * jax.random.normal(k1, (hidden, inchannels * 2), jnp.float32),
        "b1": jnp.zeros((hidden,), jnp.float32),
        "w2": 0.01 * jax.random.normal(k2, (inchannels, hidden), jnp.float32),
        "b2": jnp.zeros((inchannels,), jnp.float32),
    }


def ata_reference(low_x, high_x, params):
    """Pure-JAX reference of the PyTorch forward, for correctness check."""
    n, c, _, _ = low_x.shape
    x = jnp.concatenate([low_x, high_x], axis=1)           # (N, 2C, H, W)
    x = jnp.mean(x, axis=(2, 3)).astype(jnp.float32)       # (N, 2C)
    x = x @ params["w1"].T + params["b1"]
    x = jnp.maximum(x, 0.0)
    x = x @ params["w2"].T + params["b2"]
    x = jax.nn.sigmoid(x).reshape(n, c, 1, 1)
    return (low_x.astype(jnp.float32) * x + high_x.astype(jnp.float32))


if __name__ == "__main__":
    key = jax.random.PRNGKey(0)
    k_low, k_high, k_params = jax.random.split(key, 3)

    N, C, H, W = 2, 16, 16, 16          # reduction=8 -> hidden = 2
    low_x = jax.random.normal(k_low, (N, C, H, W), jnp.float32)
    high_x = jax.random.normal(k_high, (N, C, H, W), jnp.float32)
    params = init_ata_params(k_params, C, reduction=8)

    # 1) fused single-sweep path (small per-sample slabs fit VMEM).
    fwd = jax.jit(ata_forward)
    out = jax.block_until_ready(fwd(low_x, high_x, params))
    ref = ata_reference(low_x, high_x, params)
    assert out.shape == (N, C, H, W) and out.dtype == low_x.dtype
    assert jnp.allclose(out, ref, atol=1e-5, rtol=1e-5)

    # 2) two-pass fallback, forced, with a ragged HW tile and the 2-way pool
    #    split (exercises masking + partial output blocks).
    H2, W2 = 10, 13                      # HW = 130, not a multiple of 128
    low2 = jax.random.normal(k_low, (N, C, H2, W2), jnp.float32)
    high2 = jax.random.normal(k_high, (N, C, H2, W2), jnp.float32)
    fwd2 = jax.jit(functools.partial(ata_forward, force_two_pass=True,
                                     tile_hw_override=128))
    out2 = jax.block_until_ready(fwd2(low2, high2, params))
    ref2 = ata_reference(low2, high2, params)
    assert jnp.allclose(out2, ref2, atol=1e-5, rtol=1e-5)

    # 3) bf16 slabs straight through (no wrapper cast round trip); the fused
    #    apply may run in native bf16 on v6e/v7x -> loose tolerance.
    low_bf = low_x.astype(jnp.bfloat16)
    high_bf = high_x.astype(jnp.bfloat16)
    out_bf = jax.block_until_ready(fwd(low_bf, high_bf, params))
    ref_bf = ata_reference(low_bf.astype(jnp.float32),
                           high_bf.astype(jnp.float32), params)
    assert out_bf.dtype == jnp.bfloat16
    assert float(jnp.max(jnp.abs(out_bf.astype(jnp.float32) - ref_bf))) < 0.1

    print("KERNEL_OK")
</pallas_src>

<mosaic_0001>
module attributes {stable_mosaic.version = 11 : i64} {
  func.func @_ata_fused_kernel(%arg0: i32, %arg1: memref<2x16xf32, #tpu.memory_space<vmem>>, %arg2: memref<2x16xf32, #tpu.memory_space<vmem>>, %arg3: memref<2x1xf32, #tpu.memory_space<vmem>>, %arg4: memref<16x2xf32, #tpu.memory_space<vmem>>, %arg5: memref<16x1xf32, #tpu.memory_space<vmem>>, %arg6: memref<1x16x256xf32, #tpu.memory_space<vmem>>, %arg7: memref<1x16x256xf32, #tpu.memory_space<vmem>>, %arg8: memref<1x16x256xf32, #tpu.memory_space<vmem>>) attributes {dimension_semantics = [#tpu.dimension_semantics<parallel>], iteration_bounds = array<i64: 2>, scalar_prefetch = 0 : i64, scratch_operands = 0 : i64, tpu.core_type = #tpu.core_type<tc>, window_params = [{pipeline_mode = #tpu.pipeline_mode<synchronous>, transform_indices = @transform_0, window_bounds = array<i64: 2, 16>}, {pipeline_mode = #tpu.pipeline_mode<synchronous>, transform_indices = @transform_1, window_bounds = array<i64: 2, 16>}, {pipeline_mode = #tpu.pipeline_mode<synchronous>, transform_indices = @transform_2, window_bounds = array<i64: 2, 1>}, {pipeline_mode = #tpu.pipeline_mode<synchronous>, transform_indices = @transform_3, window_bounds = array<i64: 16, 2>}, {pipeline_mode = #tpu.pipeline_mode<synchronous>, transform_indices = @transform_4, window_bounds = array<i64: 16, 1>}, {transform_indices = @transform_5, window_bounds = array<i64: 1, 16, 256>}, {transform_indices = @transform_6, window_bounds = array<i64: 1, 16, 256>}, {transform_indices = @transform_7, window_bounds = array<i64: 1, 16, 256>}]} {
    %c0 = arith.constant 0 : index
    %c0_0 = arith.constant 0 : index
    %c0_1 = arith.constant 0 : index
    %0 = vector.load %arg6[%c0, %c0_0, %c0_1] : memref<1x16x256xf32, #tpu.memory_space<vmem>>, vector<1x16x256xf32>
    %1 = vector.shape_cast %0 : vector<1x16x256xf32> to vector<16x256xf32>
    %c0_2 = arith.constant 0 : index
    %c0_3 = arith.constant 0 : index
    %c0_4 = arith.constant 0 : index
    %2 = vector.load %arg7[%c0_2, %c0_3, %c0_4] : memref<1x16x256xf32, #tpu.memory_space<vmem>>, vector<1x16x256xf32>
    %3 = vector.shape_cast %2 : vector<1x16x256xf32> to vector<16x256xf32>
    %cst = arith.constant dense<0.000000e+00> : vector<16xf32>
    %4 = vector.multi_reduction <add>, %1, %cst [1] : vector<16x256xf32> to vector<16xf32>
    %5 = vector.shape_cast %4 : vector<16xf32> to vector<16x1xf32>
    %cst_5 = arith.constant 3.906250e-03 : f32
    %6 = vector.broadcast %cst_5 : f32 to vector<16x1xf32>
    %7 = arith.mulf %5, %6 : vector<16x1xf32>
    %cst_6 = arith.constant dense<0.000000e+00> : vector<16xf32>
    %8 = vector.multi_reduction <add>, %3, %cst_6 [1] : vector<16x256xf32> to vector<16xf32>
    %9 = vector.shape_cast %8 : vector<16xf32> to vector<16x1xf32>
    %cst_7 = arith.constant 3.906250e-03 : f32
    %10 = vector.broadcast %cst_7 : f32 to vector<16x1xf32>
    %11 = arith.mulf %9, %10 : vector<16x1xf32>
    %c0_8 = arith.constant 0 : index
    %c0_9 = arith.constant 0 : index
    %12 = vector.load %arg1[%c0_8, %c0_9] : memref<2x16xf32, #tpu.memory_space<vmem>>, vector<2x16xf32>
    %cst_10 = arith.constant dense<0.000000e+00> : vector<2x1xf32>
    %13 = tpu.matmul %12, %7, %cst_10 {dimension_numbers = #tpu.dot_dimension_numbers<[1], [0], [0], [1], [0, 0, 1, 1], [], []>} : vector<2x16xf32>, vector<16x1xf32>, vector<2x1xf32> -> vector<2x1xf32>
    %c0_11 = arith.constant 0 : index
    %c0_12 = arith.constant 0 : index
    %14 = vector.load %arg2[%c0_11, %c0_12] : memref<2x16xf32, #tpu.memory_space<vmem>>, vector<2x16xf32>
    %cst_13 = arith.constant dense<0.000000e+00> : vector<2x1xf32>
    %15 = tpu.matmul %14, %11, %cst_13 {dimension_numbers = #tpu.dot_dimension_numbers<[1], [0], [0], [1], [0, 0, 1, 1], [], []>} : vector<2x16xf32>, vector<16x1xf32>, vector<2x1xf32> -> vector<2x1xf32>
    %16 = arith.addf %13, %15 : vector<2x1xf32>
    %c0_14 = arith.constant 0 : index
    %c0_15 = arith.constant 0 : index
    %17 = vector.load %arg3[%c0_14, %c0_15] : memref<2x1xf32, #tpu.memory_space<vmem>>, vector<2x1xf32>
    %18 = arith.addf %16, %17 : vector<2x1xf32>
    %cst_16 = arith.constant 0.000000e+00 : f32
    %19 = vector.broadcast %cst_16 : f32 to vector<2x1xf32>
    %20 = arith.maximumf %18, %19 : vector<2x1xf32>
    %c0_17 = arith.constant 0 : index
    %c0_18 = arith.constant 0 : index
    %21 = vector.load %arg4[%c0_17, %c0_18] : memref<16x2xf32, #tpu.memory_space<vmem>>, vector<16x2xf32>
    %cst_19 = arith.constant dense<0.000000e+00> : vector<16x1xf32>
    %22 = tpu.matmul %21, %20, %cst_19 {dimension_numbers = #tpu.dot_dimension_numbers<[1], [0], [0], [1], [0, 0, 1, 1], [], []>} : vector<16x2xf32>, vector<2x1xf32>, vector<16x1xf32> -> vector<16x1xf32>
    %c0_20 = arith.constant 0 : index
    %c0_21 = arith.constant 0 : index
    %23 = vector.load %arg5[%c0_20, %c0_21] : memref<16x1xf32, #tpu.memory_space<vmem>>, vector<16x1xf32>
    %24 = arith.addf %22, %23 : vector<16x1xf32>
    %25 = arith.negf %24 : vector<16x1xf32>
    %26 = math.exp %25 : vector<16x1xf32>
    %cst_22 = arith.constant 1.000000e+00 : f32
    %27 = vector.broadcast %cst_22 : f32 to vector<16x1xf32>
    %28 = arith.addf %27, %26 : vector<16x1xf32>
    %29 = arith.divf %27, %28 : vector<16x1xf32>
    %30 = vector.broadcast %29 : vector<16x1xf32> to vector<16x256xf32>
    %31 = arith.mulf %1, %30 : vector<16x256xf32>
    %32 = arith.addf %31, %3 : vector<16x256xf32>
    %c0_23 = arith.constant 0 : index
    %c0_24 = arith.constant 0 : index
    %c0_25 = arith.constant 0 : index
    %33 = vector.load %arg8[%c0_23, %c0_24, %c0_25] : memref<1x16x256xf32, #tpu.memory_space<vmem>>, vector<1x16x256xf32>
    %34 = vector.shape_cast %33 : vector<1x16x256xf32> to vector<16x256xf32>
    %35 = vector.shape_cast %32 : vector<16x256xf32> to vector<1x16x256xf32>
    tpu.vector_store %arg8[%c0_23, %c0_24, %c0_25], %35 {strides = array<i32>} : memref<1x16x256xf32, #tpu.memory_space<vmem>>, vector<1x16x256xf32>,
    return
  }
  func.func @transform_0(%arg0: i32) -> (i32, i32) {
    %c0_i32 = arith.constant 0 : i32
    %c0_i32_0 = arith.constant 0 : i32
    %c0_i32_1 = arith.constant 0 : i32
    return %c0_i32, %c0_i32_0 : i32, i32
  }
  func.func @transform_1(%arg0: i32) -> (i32, i32) {
    %c0_i32 = arith.constant 0 : i32
    %c0_i32_0 = arith.constant 0 : i32
    %c0_i32_1 = arith.constant 0 : i32
    return %c0_i32, %c0_i32_0 : i32, i32
  }
  func.func @transform_2(%arg0: i32) -> (i32, i32) {
    %c0_i32 = arith.constant 0 : i32
    %c0_i32_0 = arith.constant 0 : i32
    %c0_i32_1 = arith.constant 0 : i32
    return %c0_i32, %c0_i32_0 : i32, i32
  }
  func.func @transform_3(%arg0: i32) -> (i32, i32) {
    %c0_i32 = arith.constant 0 : i32
    %c0_i32_0 = arith.constant 0 : i32
    %c0_i32_1 = arith.constant 0 : i32
    return %c0_i32, %c0_i32_0 : i32, i32
  }
  func.func @transform_4(%arg0: i32) -> (i32, i32) {
    %c0_i32 = arith.constant 0 : i32
    %c0_i32_0 = arith.constant 0 : i32
    %c0_i32_1 = arith.constant 0 : i32
    return %c0_i32, %c0_i32_0 : i32, i32
  }
  func.func @transform_5(%arg0: i32) -> (i32, i32, i32) {
    %c0_i32 = arith.constant 0 : i32
    %c0_i32_0 = arith.constant 0 : i32
    %c0_i32_1 = arith.constant 0 : i32
    return %arg0, %c0_i32, %c0_i32_0 : i32, i32, i32
  }
  func.func @transform_6(%arg0: i32) -> (i32, i32, i32) {
    %c0_i32 = arith.constant 0 : i32
    %c0_i32_0 = arith.constant 0 : i32
    %c0_i32_1 = arith.constant 0 : i32
    return %arg0, %c0_i32, %c0_i32_0 : i32, i32, i32
  }
  func.func @transform_7(%arg0: i32) -> (i32, i32, i32) {
    %c0_i32 = arith.constant 0 : i32
    %c0_i32_0 = arith.constant 0 : i32
    %c0_i32_1 = arith.constant 0 : i32
    return %arg0, %c0_i32, %c0_i32_0 : i32, i32, i32
  }
}

</mosaic_0001>

<bundles_post_ra>
// kernel: ata_forward.1
= control target key start
LH: loop header
LB: loop body
LE: loop exit
PB: predicated region body
PF: predicated region fallthrough
CT: control target
= control target key end

     0   :  { %s797_s24 = smov 0   ;;  %s875_s0 = inlined_call_operand.vmem [shape: f32[2,16], index: 0, kind: input, shape index: {}]   ;;  %s876_s1 = inlined_call_operand.vmem [shape: f32[2,16], index: 1, kind: input, shape index: {}]   ;;  %s877_s2 = inlined_call_operand.vmem [shape: f32[2,1], index: 2, kind: input, shape index: {}]   ;;  %s878_s3 = inlined_call_operand.vmem [shape: f32[16,2], index: 3, kind: input, shape index: {}]   ;;  %s879_s4 = inlined_call_operand.vmem [shape: f32[16,1], index: 4, kind: input, shape index: {}]   ;;  %s880_s5 = inlined_call_operand.vmem [shape: f32[2,16,256], index: 5, kind: input, shape index: {}]   ;;  %s881_s6 = inlined_call_operand.vmem [shape: f32[2,16,256], index: 6, kind: input, shape index: {}]   ;;  %s882_s7 = inlined_call_operand.vmem [shape: f32[2,16,256], index: 7, kind: output, shape index: {}]  }
   0x1 LB: > { %s666_s25 = sadd.s32 4294967295, %s751_s24   ;;  %p670_p0 = scmp.ge.s32.totalorder %s751_s24, 1  ;;  %s751_s24 = sphi %s797_s24, %s17_s24  }
   0x2   : > { %p247_p1 = scmp.lt.s32.totalorder %s751_s24, 3 }
   0x4   : > { %p248_p2 = pnand %p670_p0, %p247_p1 }
   0x5   : > { %p284_p3 = scmp.lt.s32.totalorder (!%p248_p2), %s666_s25, 1  ;;  %v753_v12 = vmov (!%p248_p2), 0.0|0.0   ;;  %vm754_vm0 = vmmov (!%p248_p2), 0   ;;  %v755_v13 = vmov (!%p248_p2), 0.0   ;;  %v324_v24 = vld [vmem:[%s876_s1] sm:$0x3] (!%p248_p2) }
   0x6   : > { %251 = sbr.rel (%p248_p2) target bundleno = 767 (0x2ff), region = 48  ;;  %717 = vmatprep.subr.bf16.mxu0 (!%p248_p2), %v753_v12  ;;  %720 = vmatprep.subr.bf16.mxu1 (!%p248_p2), %v753_v12  ;;  %vm325_vm1 = vcmask (!%p248_p2), 130048   ;;  %v323_v25 = vld [vmem:[%s875_s0] sm:$0x3] (!%p248_p2)  ;;  %vm479_vm2 = vcmask (!%p248_p2), 15360   ;;  %vm486_vm3 = vcmask (!%p248_p2), 1041408  }
   0x7   : > { %702 = vmatprep.mubr.msk.f32.mxu0 (!%p248_p2), %vm754_vm0, %v755_v13  ;;  %709 = vmatprep.mubr.msk.f32.mxu1 (!%p248_p2), %vm754_vm0, %v755_v13  ;;  %v475_v26 = vld [vmem:[%s878_s3] sm:$0xff] (!%p248_p2)  ;;  %v476_v35 = vld [vmem:[%s878_s3 + $0x8] sm:$0xff] (!%p248_p2)  ;;  %v756_v36 = vmov (!%p248_p2), 0  }
   0x8   : > { %v472_v29 = vld [vmem:[%s877_s2] sm:$0x3] (!%p248_p2)  ;;  %736 = vset.pattern.permute.xlu1 (!%p248_p2), %v756_v36  ;;  %735 = vset.pattern.permute.xlu0 (!%p248_p2), %v756_v36  ;;  %v478_v37 = vld [vmem:[%s879_s4 + $0x8] sm:$0xff] (!%p248_p2) }
   0x9   : > { %v477_v38 = vld [vmem:[%s879_s4] sm:$0xff] (!%p248_p2) }
   0xd   : > { %s884_s25 = smov (!%p284_p3, %s666_s25), 1 }
   0xe   : > { %s805_s26 = sshll.u32 %s884_s25, 5 }
   0xf   : > { %s293_s29 = scalar_lea.vmem %s881_s6, %s805_s26  ;;  %s288_s9 = scalar_lea.vmem %s880_s5, %s805_s26 }
  0x10   : > { %v815_v0 = vld [vmem:[%s293_s29] sm:$0xff]  ;;  %v817_v1 = vld [vmem:[%s293_s29 + $0x8] sm:$0xff]  ;;  %v825_v5 = vld [vmem:[%s293_s29 + $0x10] sm:$0xff]  ;;  %s298_s28 = scalar_lea.vmem %s882_s7, %s805_s26 }
  0x11   : > { %v819_v2 = vld [vmem:[%s288_s9] sm:$0xff]  ;;  %v315_v3 = vadd.f32 %v817_v1, %v815_v0  ;;  %v823_v4 = vld [vmem:[%s288_s9 + $0x8] sm:$0xff]  ;;  %v827_v6 = vld [vmem:[%s293_s29 + $0x18] sm:$0xff] }
  0x12   : > { %v307_v7 = vadd.f32 %v823_v4, %v819_v2  ;;  %v831_v8 = vld [vmem:[%s288_s9 + $0x10] sm:$0xff]  ;;  %v833_v9 = vld [vmem:[%s288_s9 + $0x18] sm:$0xff]  ;;  %v318_v10 = vadd.f32 %v827_v6, %v825_v5 }
  0x13   : > { %316 = vadd.xlane.f32.xlu1 %v315_v3  ;;  %v310_v11 = vadd.f32 %v833_v9, %v831_v8 }
  0x14   : > { %308 = vadd.xlane.f32.xlu0 %v307_v7 }
  0x17   : > { %319 = vadd.xlane.f32.xlu1 %v318_v10 }
  0x18   : > { %311 = vadd.xlane.f32.xlu0 %v310_v11 }
  0xa0   : > { %v317_v14 = vpop.xlane.xlu1 %316 }
  0xa1   : > { %v309_v15 = vpop.xlane.xlu0 %308  ;;  %v321_v17 = vmul.f32 0.00390625, %v317_v14 }
  0xa2   : > { %v313_v20 = vmul.f32 0.00390625, %v309_v15 }
  0xa4   : > { %v320_v16 = vpop.xlane.xlu1 %319 }
  0xa5   : > { %v322_v18 = vmul.f32 0.00390625, %v320_v16  ;;  %v312_v19 = vpop.xlane.xlu0 %311 }
  0xa6   : > { %v314_v21 = vmul.f32 0.00390625, %v312_v19 }
  0xa7   : > { %v718_v22 = vpack.c.bf16 %v322_v18, %v321_v17 }
  0xa8   : > { %v721_v23 = vpack.c.bf16 %v314_v21, %v313_v20 }
  0xa9   : > { %719 = vmatpush3.bf16.msra.mxu0 %v718_v22 }
  0xaa   : > { %722 = vmatpush3.bf16.msra.mxu1 %v721_v23 }
  0xac   : > { %703 = vmatmul.mubr.msk.f32.vlgmr.msra.gmra.mrb[0].mxu0 %vm325_vm1, %v324_v24 }
  0xad   : > { %710 = vmatmul.mubr.msk.f32.vlgmr.msra.gmra.mrb[0].mxu1 %vm325_vm1, %v323_v25  ;;  %714 = vmatprep.mubr.msk.f32.mxu0 %vm479_vm2, %v475_v26 }
 0x17f   : > { %v395_v27 = vpop.f32.mrb[0].mxu0 }
 0x180   : > { %v468_v28 = vpop.f32.mrb[0].mxu1  ;;  %v704_v30 = vpop.f32.mrb[1].mxu0 }
 0x181   : > { %v469_v31 = vadd.f32 %v468_v28, %v395_v27  ;;  %v711_v32 = vpop.f32.mrb[1].mxu1 }
 0x183   : > { %v473_v33 = vadd.f32 %v472_v29, %v469_v31 }
 0x185   : > { %v474_v34 = vmax.f32 %v473_v33, 0.0 }
 0x187   : > { %712 = vmatprep.subr.msk.mxu0 %vm486_vm3, %v474_v34 }
 0x188   : > { %713 = vmatpush3.msk.msra.mxu0 %vm486_vm3, %v474_v34 }
 0x189   : > { %715 = vmatmul.mubr.msk.f32.vlgmr.msra.gmra.mrb[2].mxu0 %vm479_vm2, %v476_v35 }
 0x25c   : > { %v716_v39 = vpop.f32.mrb[2].mxu0 }
 0x25d   : > { %v562_v40 = vadd.f32 %v716_v39, %v478_v37  ;;  %v556_v41 = vpop.f32.mrb[3].mxu0 }
 0x25e   : > { %v557_v42 = vadd.f32 %v556_v41, %v477_v38 }
 0x25f   : > { %v683_v43 = vmul.f32 -1.442695, %v562_v40 }
 0x260   : > { %v682_v44 = vmul.f32 -1.442695, %v557_v42 }
 0x261   : > { %737 = vpow2.f32 %v683_v43 }
 0x262   : > { %739 = vpow2.f32 %v682_v44 }
 0x26b   : > { %v738_v45 = vpop.eup %737 }
 0x26c   : > { %v740_v46 = vpop.eup %739  ;;  %v572_v47 = vadd.f32 1.0, %v738_v45 }
 0x26d   : > { %v571_v48 = vadd.f32 1.0, %v740_v46 }
 0x26e   : > { %741 = vrcp.f32 %v572_v47 }
 0x26f   : > { %743 = vrcp.f32 %v571_v48 }
 0x278   : > { %v742_v49 = vpop.eup %741 }
 0x279   : > { %v744_v50 = vpop.eup %743  ;;  %584 = vperm.xlu1 %736, %v742_v49  }
 0x27a   : > { %579 = vperm.xlu0 %735, %v744_v50  }
 0x2f8   : > { %v585_v51 = vpop.permute.xlu1 %584 }
 0x2f9   : > { %v589_v52 = vmul.f32 %v585_v51, %v831_v8  ;;  %v590_v53 = vmul.f32 %v585_v51, %v833_v9  ;;  %v580_v54 = vpop.permute.xlu0 %579 }
 0x2fa   : > { %v587_v55 = vmul.f32 %v580_v54, %v819_v2  ;;  %v588_v56 = vmul.f32 %v580_v54, %v823_v4 }
 0x2fb   : > { %v593_v57 = vadd.f32 %v589_v52, %v825_v5  ;;  %v594_v58 = vadd.f32 %v590_v53, %v827_v6 }
 0x2fc   : > { %v591_v59 = vadd.f32 %v587_v55, %v815_v0  ;;  %v592_v60 = vadd.f32 %v588_v56, %v817_v1 }
 0x2fd   : > { %597 = vst [vmem:[%s298_s28 + $0x10] sm:$0xff] %v593_v57  ;;  %598 = vst [vmem:[%s298_s28 + $0x18] sm:$0xff] %v594_v58 }
 0x2fe   : > { %595 = vst [vmem:[%s298_s28] sm:$0xff] %v591_v59  ;;  %596 = vst [vmem:[%s298_s28 + $0x8] sm:$0xff] %v592_v60 }
 0x2ff PF: > { %s17_s24 = sadd.s32 1, %s751_s24  }
 0x300   : > { %p14_p4 = scmp.ge.s32.totalorder %s17_s24, 4  }
 0x302   :  { %16 = sbr.rel (!%p14_p4) target bundleno = 1 (0x1), region = 81 }

</bundles_post_ra>
